<compile_context>
chip_gen: v5e
topology: v5e:2x2
jax: 0.10.0
libtpu: 0.0.40
codegen_flags: <defaults>
</compile_context>

<pallas_src>
import functools

import jax
import jax.numpy as jnp
from jax import lax
from jax.experimental import pallas as pl
from jax.experimental.pallas import tpu as pltpu


def _agg_mean_kernel(x_ref, s_ref, o_ref, *, n_feat, n_inst):
    # x_ref: (TB, F*N) lane-dense input tile
    # s_ref: (F*N, 2F) resident binary selection matrix (same block every step)
    # o_ref: (TB, 2F)  lane-dense output tile, columns [0:F]=obs, [F:2F]=mean
    acc = jnp.dot(x_ref[...], s_ref[...], preferred_element_type=jnp.float32)
    col = lax.broadcasted_iota(jnp.int32, (1, 2 * n_feat), 1)
    scale = jnp.where(col < n_feat, 1.0, 1.0 / (n_inst - 1)).astype(jnp.float32)
    o_ref[...] = (acc * scale).astype(o_ref.dtype)


def _selection_matrix(n_feat, n_inst, dtype):
    """(F*N, 2F) binary matrix: row f*N+0 -> col f ; rows f*N+n (n>=1) -> col F+f."""
    rows = jnp.arange(n_feat * n_inst)
    f = rows // n_inst
    n = rows % n_inst
    cols = jnp.arange(2 * n_feat)
    obs = (n == 0)[:, None] & (cols[None, :] == f[:, None])
    agg = (n >= 1)[:, None] & (cols[None, :] == (n_feat + f)[:, None])
    return (obs | agg).astype(dtype)          # exact in bf16 / f32


def _agg_mean_jax(x):
    """Pure-JAX path for tiny problems (kernel launch overhead would dominate)."""
    xobs = x[:, :, 0]
    xagg = x[:, :, 1:].mean(axis=2)
    return jnp.concatenate([xobs, xagg], axis=1)


# Below this many input elements, let XLA fuse the whole thing instead of
# paying pallas_call fixed costs (slice+reduce+concat is near-roofline anyway).
_SMALL_PROBLEM_ELEMS = 1 << 20  # 1M elements


def _choose_batch_tile(B, F, N, itemsize):
    """Batch-tile rows so double-buffered in+out blocks stay ~20 MiB total."""
    lanes_in = pl.cdiv(F * N, 128) * 128          # VMEM lane padding (flat layout)
    lanes_out = pl.cdiv(2 * F, 128) * 128
    row_bytes = (2 * lanes_in + 2 * lanes_out) * itemsize   # 2-deep pipelining
    budget = 20 << 20
    tb = max(8, budget // max(1, row_bytes))
    tb = min(tb, 1024)                            # BW saturates ~512-1024 rows
    if B >= 8 * 256:
        tb = min(tb, pl.cdiv(B, 8))               # >=8 parallel steps (v7x megacore)
    if B >= 16:
        tb = min(tb, pl.cdiv(B, 2))               # always >=2 steps when possible
    tb = min(tb, B)
    if B >= 8:
        align = 8 * max(1, 4 // itemsize)         # 8 (f32) / 16 (bf16) / 32 (int8)
        if tb >= align:
            tb = (tb // align) * align
        else:
            tb = max(8, (tb // 8) * 8)
    else:
        tb = B                                    # block == full dim (allowed)
    return int(tb)


def aggregate_instances(x, mean=True, *, force_pallas=False, batch_tile=None):
    """x: (B, F, N). Mirrors AggregateInstances.forward."""
    B, F, N = x.shape
    if N == 1 or not mean:
        # pure reshape branches, no compute -> JAX glue
        return x.reshape(B, -1)

    if not force_pallas and (B * F * N) < _SMALL_PROBLEM_ELEMS:
        return _agg_mean_jax(x)

    itemsize = jnp.dtype(x.dtype).itemsize
    if batch_tile is None:
        TB = _choose_batch_tile(B, F, N, itemsize)
    else:
        TB = int(min(batch_tile, B))
        if TB < B and TB % 8 != 0:
            TB = max(8, (TB // 8) * 8)

    x2d = x.reshape(B, F * N)                     # free contiguous reshape (lane-dense)
    sel = _selection_matrix(F, N, x.dtype)        # (F*N, 2F), DMA'd once, resident

    kernel = functools.partial(_agg_mean_kernel, n_feat=F, n_inst=N)

    bytes_accessed = (B * F * N + B * 2 * F + F * N * 2 * F) * itemsize
    cost = pl.CostEstimate(flops=2 * B * (F * N) * (2 * F),
                           transcendentals=0,
                           bytes_accessed=bytes_accessed)

    out = pl.pallas_call(
        kernel,
        out_shape=jax.ShapeDtypeStruct((B, 2 * F), x.dtype),
        grid_spec=pltpu.PrefetchScalarGridSpec(
            num_scalar_prefetch=0,
            grid=(pl.cdiv(B, TB),),
            in_specs=[pl.BlockSpec((TB, F * N), lambda i: (i, 0)),
                      pl.BlockSpec((F * N, 2 * F), lambda i: (0, 0))],
            out_specs=pl.BlockSpec((TB, 2 * F), lambda i: (i, 0)),
        ),
        compiler_params=pltpu.CompilerParams(
            # batch tiles are independent -> shard across both TCs on v7x
            dimension_semantics=("parallel",),
            vmem_limit_bytes=32 << 20,
        ),
        cost_estimate=cost,
    )(x2d, sel)

    # columns [0:F] = x[:,:,0], [F:2F] = mean(x[:,:,1:]) -> exactly
    # torch.cat([xobs, xagg], dim=1); no further reshape needed.
    return out


def _reference(x, mean=True):
    B, F, N = x.shape
    if N == 1 or not mean:
        return x.reshape(B, -1)
    xobs = x[:, :, 0]
    xagg = x[:, :, 1:].mean(axis=2)
    return jnp.concatenate([xobs, xagg], axis=1)


if __name__ == "__main__":
    key = jax.random.PRNGKey(0)

    # Shapes consistent with the Ex2-JRNMM posterior: hidden features F=32,
    # 1 observed + 7 extra instances -> N=8.
    B, F, N = 64, 32, 8
    x = jax.random.normal(key, (B, F, N), dtype=jnp.float32)

    out = jax.block_until_ready(
        aggregate_instances(x, mean=True, force_pallas=True))
    ref = _reference(x, mean=True)
    assert out.shape == (B, 2 * F), out.shape
    assert jnp.allclose(out, ref, atol=1e-5, rtol=1e-5), "mismatch vs reference"

    # batch not divisible by the tile -> exercises the partial last block
    x_odd = jax.random.normal(jax.random.PRNGKey(1), (100, F, N), dtype=jnp.float32)
    out_odd = jax.block_until_ready(
        aggregate_instances(x_odd, mean=True, force_pallas=True, batch_tile=48))
    assert jnp.allclose(out_odd, _reference(x_odd), atol=1e-5, rtol=1e-5), \
        "partial-block mismatch"

    # bf16 streaming path (binary selection matrix is exact in bf16, f32 acc)
    x_bf16 = x.astype(jnp.bfloat16)
    out_bf16 = jax.block_until_ready(
        aggregate_instances(x_bf16, mean=True, force_pallas=True))
    assert out_bf16.dtype == jnp.bfloat16
    assert jnp.allclose(out_bf16.astype(jnp.float32),
                        _reference(x_bf16.astype(jnp.float32)),
                        atol=2e-2, rtol=2e-2), "bf16 mismatch vs reference"

    # reshape-only branches and tiny-problem JAX fallback
    x1 = jax.random.normal(jax.random.PRNGKey(2), (2, 32, 1), dtype=jnp.float32)
    assert aggregate_instances(x1, mean=True).shape == (2, 32)
    assert aggregate_instances(x, mean=False).shape == (B, F * N)
    x_small = jax.random.normal(jax.random.PRNGKey(3), (4, 32, 8), dtype=jnp.float32)
    assert jnp.allclose(aggregate_instances(x_small, mean=True),
                        _reference(x_small), atol=1e-5, rtol=1e-5)

    print("KERNEL_OK")
</pallas_src>

<mosaic_0001>
module attributes {stable_mosaic.version = 11 : i64} {
  func.func @_agg_mean_kernel(%arg0: i32, %arg1: memref<32x256xf32, #tpu.memory_space<vmem>>, %arg2: memref<256x64xf32, #tpu.memory_space<vmem>>, %arg3: memref<32x64xf32, #tpu.memory_space<vmem>>) attributes {dimension_semantics = [#tpu.dimension_semantics<parallel>], iteration_bounds = array<i64: 2>, scalar_prefetch = 0 : i64, scratch_operands = 0 : i64, tpu.core_type = #tpu.core_type<tc>, window_params = [{transform_indices = @transform_0, window_bounds = array<i64: 32, 256>}, {pipeline_mode = #tpu.pipeline_mode<synchronous>, transform_indices = @transform_1, window_bounds = array<i64: 256, 64>}, {transform_indices = @transform_2, window_bounds = array<i64: 32, 64>}]} {
    %c0 = arith.constant 0 : index
    %c0_0 = arith.constant 0 : index
    %0 = vector.load %arg1[%c0, %c0_0] : memref<32x256xf32, #tpu.memory_space<vmem>>, vector<32x256xf32>
    %c0_1 = arith.constant 0 : index
    %c0_2 = arith.constant 0 : index
    %1 = vector.load %arg2[%c0_1, %c0_2] : memref<256x64xf32, #tpu.memory_space<vmem>>, vector<256x64xf32>
    %cst = arith.constant dense<0.000000e+00> : vector<32x64xf32>
    %2 = tpu.matmul %0, %1, %cst {dimension_numbers = #tpu.dot_dimension_numbers<[1], [0], [0], [1], [0, 0, 1, 1], [], []>} : vector<32x256xf32>, vector<256x64xf32>, vector<32x64xf32> -> vector<32x64xf32>
    %3 = tpu.iota {dimensions = array<i32: 1>} : vector<1x64xi32>
    %c32_i32 = arith.constant 32 : i32
    %4 = vector.broadcast %c32_i32 : i32 to vector<1x64xi32>
    %5 = arith.cmpi slt, %3, %4 : vector<1x64xi32>
    %cst_3 = arith.constant 1.000000e+00 : f32
    %cst_4 = arith.constant 0.142857149 : f32
    %6 = vector.broadcast %cst_3 : f32 to vector<1x64xf32>
    %7 = vector.broadcast %cst_4 : f32 to vector<1x64xf32>
    %8 = arith.select %5, %6, %7 : vector<1x64xi1>, vector<1x64xf32>
    %9 = vector.broadcast %8 : vector<1x64xf32> to vector<32x64xf32>
    %10 = arith.mulf %2, %9 : vector<32x64xf32>
    %c0_5 = arith.constant 0 : index
    %c0_6 = arith.constant 0 : index
    %11 = vector.load %arg3[%c0_5, %c0_6] : memref<32x64xf32, #tpu.memory_space<vmem>>, vector<32x64xf32>
    tpu.vector_store %arg3[%c0_5, %c0_6], %10 {strides = array<i32>} : memref<32x64xf32, #tpu.memory_space<vmem>>, vector<32x64xf32>,
    return
  }
  func.func @transform_0(%arg0: i32) -> (i32, i32) {
    %c0_i32 = arith.constant 0 : i32
    %c0_i32_0 = arith.constant 0 : i32
    return %arg0, %c0_i32 : i32, i32
  }
  func.func @transform_1(%arg0: i32) -> (i32, i32) {
    %c0_i32 = arith.constant 0 : i32
    %c0_i32_0 = arith.constant 0 : i32
    %c0_i32_1 = arith.constant 0 : i32
    return %c0_i32, %c0_i32_0 : i32, i32
  }
  func.func @transform_2(%arg0: i32) -> (i32, i32) {
    %c0_i32 = arith.constant 0 : i32
    %c0_i32_0 = arith.constant 0 : i32
    return %arg0, %c0_i32 : i32, i32
  }
}

</mosaic_0001>

<bundles_post_ra>
// kernel: tpu_custom_call.1
= control target key start
LH: loop header
LB: loop body
LE: loop exit
PB: predicated region body
PF: predicated region fallthrough
CT: control target
= control target key end

     0   :  { %7 = vsyncpa [#allocation3], 0  ;;  %s696_s0 = inlined_call_operand.vmem [shape: f32[64,256], index: 0, kind: input, shape index: {}]   ;;  %s697_s1 = inlined_call_operand.vmem [shape: f32[256,64], index: 1, kind: input, shape index: {}]   ;;  %s698_s2 = inlined_call_operand.hbm [shape: f32[64,64], index: 2, kind: output, shape index: {}]  }
   0x1   :  { %9 = vsyncpa [#allocation3 + $0x1], 0  ;;  %s508_s9 = smov 0   ;;  %s510_s10 = smov 0  }
   0x2   :  { %s512_s11 = smov 0   ;;  %s514_s12 = smov 0  }
   0x3 LB: > { %s529_s13 = sadd.s32 4294967295, %s488_s12   ;;  %s337_s14 = sadd.s32 4294967294, %s488_s12   ;;  %s488_s12 = sphi %s514_s12, %s704_s12   ;;  %s484_s11 = sphi %s512_s11, %s703_s11   ;;  %s480_s10 = sphi %s510_s10, %s702_s10   ;;  %s476_s9 = sphi %s508_s9, %s701_s9  }
   0x4   : > { %s533_s15 = sadd.s32 1, %s488_s12   ;;  %s69_s16 = sadd.s32 1, %s484_s11 }
   0x5   : > { %s66_s17 = ssub.s32 %s488_s12, %s533_s15  ;;  %p79_p0 = scmp.ne.s32.totalorder %s484_s11, %s480_s10 }
   0x6   : > { %p67_p1 = scmp.eq.s32.totalorder %s66_s17, 0  ;;  %p80_p2 = scmp.eq.s32.totalorder %s529_s13, 1 }
   0x7   : > { %p85_p3 = scmp.ne.s32.totalorder %s480_s10, %s476_s9  ;;  %p86_p4 = scmp.eq.s32.totalorder %s337_s14, 1 }
   0x8   : > { %s544_s18 = scalar_select %p67_p1, %s484_s11, %s69_s16  }
   0x9   : > { %p546_p5 = por %p80_p2, %p79_p0  ;;  %p550_p6 = por %p86_p4, %p85_p3 }
   0xa   : > { %p340_p7 = scmp.ge.s32.totalorder %s488_s12, 1  ;;  %p117_p8 = scmp.lt.s32.totalorder %s488_s12, 3 }
   0xc   : > { %p118_p9 = pnand %p340_p7, %p117_p8 }
   0xd   : > { %s342_s6 = sshll.u32 (!%p118_p9), %s529_s13, 2  ;;  %s137_s5 = sand.u32 (!%p118_p9), 1, %s480_s10  }
   0xe   : > { %121 = sbr.rel (%p118_p9) target bundleno = 200 (0xc8), region = 28  ;;  %p141_p10 = scmp.lt.s32.totalorder (!%p118_p9), %s342_s6, 7 }
   0xf   : > { %s341_s7 = sshll.u32 (!%p118_p9), %s137_s5, 5  ;;  %s446_s27 = scalar_lea.hbm (!%p118_p9), %s698_s2, 64 }
  0x10   : > { %s139_s8 = scalar_lea.vmem (!%p118_p9), [#allocation2], %s341_s7 }
  0x11   : > { %s272_s22 = sshll.u32 (!%p118_p9), %s139_s8, 4  ;;  %s273_s22 = int_to_ptr.vmem [resolvable:$true] %s272_s22 }
  0x13   : > { %v171_v0 = vld [vmem:[%s697_s1 + $0x78] sm:$0xff]  ;;  %v170_v2 = vld [vmem:[%s697_s1 + $0x70] sm:$0xff]  ;;  %v169_v4 = vld [vmem:[%s697_s1 + $0x68] sm:$0xff]  ;;  %s706_s6 = smov (!%p141_p10, %s342_s6), 7  ;;  %v246_v40 = vlaneseq  ;;  %v490_v44 = vmov 0.14285715  }
  0x14   : > { %v187_v1 = vld [vmem:[%s697_s1 + $0xf8] sm:$0xff]  ;;  %352 = vmatpush.msra.mxu2 %v171_v0  ;;  %v186_v3 = vld [vmem:[%s697_s1 + $0xf0] sm:$0xff]  ;;  %v185_v5 = vld [vmem:[%s697_s1 + $0xe8] sm:$0xff]  ;;  %188 = vmatpush.msra.mxu0 %v171_v0  ;;  %s350_s14 = sshll.u32 %s706_s6, 4  ;;  %vm254_vm1 = vcmask 523264  }
  0x15   : > { %368 = vmatpush.msra.mxu3 %v187_v1  ;;  %217 = vmatpush.msra.mxu1 %v187_v1  ;;  %v168_v6 = vld [vmem:[%s697_s1 + $0x60] sm:$0xff]  ;;  %v167_v8 = vld [vmem:[%s697_s1 + $0x58] sm:$0xff]  ;;  %v166_v10 = vld [vmem:[%s697_s1 + $0x50] sm:$0xff]  ;;  %s145_s28 = scalar_lea.vmem %s696_s0, %s350_s14  ;;  %v247_v41 = vand.u32 127, %v246_v40  ;;  %s351_s14 = sshll.u32 %s529_s13, 5 }
  0x16   : > { %353 = vmatpush.msra.mxu2 %v170_v2  ;;  %v184_v7 = vld [vmem:[%s697_s1 + $0xe0] sm:$0xff]  ;;  %189 = vmatpush.msra.mxu0 %v170_v2  ;;  %v183_v9 = vld [vmem:[%s697_s1 + $0xd8] sm:$0xff]  ;;  %v182_v11 = vld [vmem:[%s697_s1 + $0xd0] sm:$0xff]  ;;  %s271_s21 = scalar_lea.hbm %s698_s2, %s351_s14  ;;  %s260_s13 = scalar_lea.sflag [#allocation3], %s137_s5 }
  0x17   : > { %369 = vmatpush.msra.mxu3 %v186_v3  ;;  %218 = vmatpush.msra.mxu1 %v186_v3  ;;  %v165_v12 = vld [vmem:[%s697_s1 + $0x48] sm:$0xff]  ;;  %v164_v14 = vld [vmem:[%s697_s1 + $0x40] sm:$0xff]  ;;  %v163_v16 = vld [vmem:[%s697_s1 + $0x38] sm:$0xff]  ;;  %vm248_vm0 = vcmp.lt.s32.totalorder %v247_v41, 32  ;;  %s274_s23 = sshll.u32 %s271_s21, 4  ;;  %s275_s23 = int_to_ptr.hbm [resolvable:$true] %s274_s23 }
  0x18   : > { %354 = vmatpush.msra.mxu2 %v169_v4  ;;  %190 = vmatpush.msra.mxu0 %v169_v4  ;;  %v181_v13 = vld [vmem:[%s697_s1 + $0xc8] sm:$0xff]  ;;  %v180_v15 = vld [vmem:[%s697_s1 + $0xc0] sm:$0xff]  ;;  %v179_v17 = vld [vmem:[%s697_s1 + $0xb8] sm:$0xff]  ;;  %v249_v45 = vsel %vm248_vm0, 1.0, %v490_v44  ;;  %s440_s24 = sshra.s32 %s275_s23, 4  ;;  %s441_s24 = int_to_ptr.hbm [resolvable:$true] %s440_s24 }
  0x19   : > { %370 = vmatpush.msra.mxu3 %v185_v5  ;;  %219 = vmatpush.msra.mxu1 %v185_v5  ;;  %v162_v18 = vld [vmem:[%s697_s1 + $0x30] sm:$0xff]  ;;  %v161_v20 = vld [vmem:[%s697_s1 + $0x28] sm:$0xff]  ;;  %v160_v22 = vld [vmem:[%s697_s1 + $0x20] sm:$0xff]  ;;  %s442_s25 = scalar_lea.hbm %s441_s24, 32  ;;  %p447_p0 = scmp.lt.s32.totalorder %s441_s24, %s698_s2 }
  0x1a   : > { %355 = vmatpush.msra.mxu2 %v168_v6  ;;  %191 = vmatpush.msra.mxu0 %v168_v6  ;;  %v178_v19 = vld [vmem:[%s697_s1 + $0xb0] sm:$0xff]  ;;  %v177_v21 = vld [vmem:[%s697_s1 + $0xa8] sm:$0xff]  ;;  %v176_v23 = vld [vmem:[%s697_s1 + $0xa0] sm:$0xff]  ;;  %p443_p11 = scmp.ne.s32.totalorder %s441_s24, %s442_s25  ;;  %p448_p1 = scmp.lt.s32.totalorder %s446_s27, %s442_s25 }
  0x1b   : > { %371 = vmatpush.msra.mxu3 %v184_v7  ;;  %220 = vmatpush.msra.mxu1 %v184_v7  ;;  %v159_v24 = vld [vmem:[%s697_s1 + $0x18] sm:$0xff]  ;;  %v158_v26 = vld [vmem:[%s697_s1 + $0x10] sm:$0xff]  ;;  %v157_v28 = vld [vmem:[%s697_s1 + $0x8] sm:$0xff] }
  0x1c   : > { %356 = vmatpush.msra.mxu2 %v167_v8  ;;  %192 = vmatpush.msra.mxu0 %v167_v8  ;;  %v175_v25 = vld [vmem:[%s697_s1 + $0x98] sm:$0xff]  ;;  %v174_v27 = vld [vmem:[%s697_s1 + $0x90] sm:$0xff]  ;;  %v173_v29 = vld [vmem:[%s697_s1 + $0x88] sm:$0xff]  ;;  %p444_p12 = pnand %p443_p11, %p546_p5  ;;  %p449_p2 = por %p448_p1, %p447_p0 }
  0x1d   : > { %372 = vmatpush.msra.mxu3 %v183_v9  ;;  %221 = vmatpush.msra.mxu1 %v183_v9  ;;  %v156_v30 = vld [vmem:[%s697_s1] sm:$0xff]  ;;  %v153_v33 = vld [vmem:[%s145_s28 + $0x28] sm:$0xff]  ;;  %v154_v36 = vld [vmem:[%s145_s28 + $0x30] sm:$0xff] }
  0x1e   : > { %357 = vmatpush.msra.mxu2 %v166_v10  ;;  %193 = vmatpush.msra.mxu0 %v166_v10  ;;  %v172_v31 = vld [vmem:[%s697_s1 + $0x80] sm:$0xff]  ;;  %v149_v35 = vld [vmem:[%s145_s28 + $0x8] sm:$0xff]  ;;  %v155_v37 = vld [vmem:[%s145_s28 + $0x38] sm:$0xff]  ;;  %p445_p13 = pneg %p444_p12 }
  0x1f   : > { %373 = vmatpush.msra.mxu3 %v182_v11  ;;  %222 = vmatpush.msra.mxu1 %v182_v11  ;;  %v152_v32 = vld [vmem:[%s145_s28 + $0x20] sm:$0xff]  ;;  %v150_v38 = vld [vmem:[%s145_s28 + $0x10] sm:$0xff]  ;;  %v151_v39 = vld [vmem:[%s145_s28 + $0x18] sm:$0xff] }
  0x20   : > { %358 = vmatpush.msra.mxu2 %v165_v12  ;;  %194 = vmatpush.msra.mxu0 %v165_v12  ;;  %v148_v34 = vld [vmem:[%s145_s28] sm:$0xff]  ;;  %p450_p3 = pnand %p449_p2, %p445_p13 }
  0x21   : > { %374 = vmatpush.msra.mxu3 %v181_v13  ;;  %223 = vmatpush.msra.mxu1 %v181_v13 }
  0x22   : > { %359 = vmatpush.msra.mxu2 %v164_v14  ;;  %195 = vmatpush.msra.mxu0 %v164_v14 }
  0x23   : > { %375 = vmatpush.msra.mxu3 %v180_v15  ;;  %224 = vmatpush.msra.mxu1 %v180_v15 }
  0x24   : > { %360 = vmatpush.msra.mxu2 %v163_v16  ;;  %196 = vmatpush.msra.mxu0 %v163_v16 }
  0x25   : > { %376 = vmatpush.msra.mxu3 %v179_v17  ;;  %225 = vmatpush.msra.mxu1 %v179_v17 }
  0x26   : > { %361 = vmatpush.msra.mxu2 %v162_v18  ;;  %197 = vmatpush.msra.mxu0 %v162_v18 }
  0x27   : > { %377 = vmatpush.msra.mxu3 %v178_v19  ;;  %226 = vmatpush.msra.mxu1 %v178_v19 }
  0x28   : > { %362 = vmatpush.msra.mxu2 %v161_v20  ;;  %198 = vmatpush.msra.mxu0 %v161_v20 }
  0x29   : > { %378 = vmatpush.msra.mxu3 %v177_v21  ;;  %227 = vmatpush.msra.mxu1 %v177_v21 }
  0x2a   : > { %363 = vmatpush.msra.mxu2 %v160_v22  ;;  %199 = vmatpush.msra.mxu0 %v160_v22 }
  0x2b   : > { %379 = vmatpush.msra.mxu3 %v176_v23  ;;  %228 = vmatpush.msra.mxu1 %v176_v23 }
  0x2c   : > { %364 = vmatpush.msra.mxu2 %v159_v24  ;;  %200 = vmatpush.msra.mxu0 %v159_v24 }
  0x2d   : > { %380 = vmatpush.msra.mxu3 %v175_v25  ;;  %229 = vmatpush.msra.mxu1 %v175_v25 }
  0x2e   : > { %365 = vmatpush.msra.mxu2 %v158_v26  ;;  %201 = vmatpush.msra.mxu0 %v158_v26 }
  0x2f   : > { %381 = vmatpush.msra.mxu3 %v174_v27  ;;  %230 = vmatpush.msra.mxu1 %v174_v27 }
  0x30   : > { %366 = vmatpush.msra.mxu2 %v157_v28  ;;  %202 = vmatpush.msra.mxu0 %v157_v28 }
  0x31   : > { %382 = vmatpush.msra.mxu3 %v173_v29  ;;  %231 = vmatpush.msra.mxu1 %v173_v29 }
  0x32   : > { %367 = vmatpush.msra.mxu2 %v156_v30  ;;  %203 = vmatpush.msra.mxu0 %v156_v30 }
  0x33   : > { %383 = vmatpush.msra.mxu3 %v172_v31  ;;  %210 = vmatmul.f32.vlgmr.msra.gmra.mxu2 %v152_v32 }
  0x34   : > { %239 = vmatmul.f32.vlgmr.msra.gmra.mxu3 %v153_v33  ;;  %232 = vmatpush.msra.mxu1 %v172_v31 }
  0x35   : > { %204 = vmatmul.f32.vlgmr.msra.gmra.mxu0 %v148_v34  ;;  %233 = vmatmul.f32.vlgmr.msra.gmra.mxu1 %v149_v35 }
  0x3b   : > { %213 = vmatmul.f32.gmra.mxu2 %v154_v36 }
  0x3c   : > { %242 = vmatmul.f32.gmra.mxu3 %v155_v37 }
  0x3d   : > { %207 = vmatmul.f32.gmra.mxu0 %v150_v38  ;;  %236 = vmatmul.f32.gmra.mxu1 %v151_v39 }
  0xb2   : > { %v205_v42 = vpop.f32.mrf.mxu0  ;;  %v234_v43 = vpop.f32.mrf.mxu1 }
  0xb3   : > { %v235_v46 = vadd.f32 %v234_v43, %v205_v42 }
  0xb5   : > { %v250_v47 = vmul.f32 %v249_v45, %v235_v46 }
  0xb6   : > { %v211_v48 = vpop.f32.mrf.mxu2 }
  0xb7   : > { %v240_v49 = vpop.f32.mrf.mxu3  ;;  %255 = vst.msk [vmem:[%s139_s8] sm:$0xff] %vm254_vm1, %v250_v47 }
  0xb8   : > { %v241_v50 = vadd.f32 %v240_v49, %v211_v48 }
  0xba   : > { %v252_v51 = vmul.f32 %v249_v45, %v241_v50  ;;  %v208_v52 = vpop.f32.mrf.mxu0  ;;  %v237_v53 = vpop.f32.mrf.mxu1 }
  0xbb   : > { %v238_v54 = vadd.f32 %v237_v53, %v208_v52 }
  0xbc   : > { %257 = vst.msk [vmem:[%s139_s8 + $0x10] sm:$0xff] %vm254_vm1, %v252_v51 }
  0xbd   : > { %v251_v55 = vmul.f32 %v249_v45, %v238_v54 }
  0xbe   : > { %v214_v56 = vpop.f32.mrf.mxu2 }
  0xbf   : > { %v243_v57 = vpop.f32.mrf.mxu3  ;;  %256 = vst.msk [vmem:[%s139_s8 + $0x8] sm:$0xff] %vm254_vm1, %v251_v55 }
  0xc0   : > { %v244_v58 = vadd.f32 %v243_v57, %v214_v56 }
  0xc2   : > { %v253_v59 = vmul.f32 %v249_v45, %v244_v58 }
  0xc4   : > { %258 = vst.msk [vmem:[%s139_s8 + $0x18] sm:$0xff] %vm254_vm1, %v253_v59 }
  0xc5   : > { %453 = shalt.err (!%p450_p3)
}
  0xc6   : > { %s491_s30 = smov 128   ;;  %s492_s3 = smov 8  }
  0xc7   : > { %384 = dma.vmem_to_hbm [thread:$0]  (%p546_p5), %s273_s22, 512, %s275_s23, %s260_s13, %s491_s30, %s491_s30, %s492_s3  }
  0xc8 PF: > { %p390_p4 = scmp.ge.s32.totalorder %s488_s12, 2  ;;  %s289_s4 = sand.u32 1, %s476_s9  }
  0xc9   : > { %s290_s5 = scalar_lea.sflag [#allocation3], %s289_s4 }
  0xca   : > { %p387_p7 = pnand %p390_p4, %p550_p6 }
  0xcc   : > { %p388_p8 = pneg %p387_p7 }
  0xce   : > { %471 = dma.done.wait (%p388_p8), %s290_s5, 512  }
  0xcf   : > { %473 = vsyncadd (%p388_p8), %s290_s5, 4294966784  ;;  %p12_p9 = scmp.ge.s32.totalorder %s533_s15, 4   ;;  %s701_s9 = smov %s480_s10 }
  0xd0   : > { %s702_s10 = smov %s484_s11  ;;  %s703_s11 = smov %s544_s18 }
  0xd1   : > { %s704_s12 = smov %s533_s15  ;;  %14 = sbr.rel (!%p12_p9) target bundleno = 3 (0x3), region = 63 }
  0xd6   :  { %296 = vsyncpa [#allocation3], 1 }
  0xd7   :  { %298 = vsyncpa [#allocation3 + $0x1], 1 }

</bundles_post_ra>
